<compile_context>
chip_gen: v5e
topology: v5e:2x2
jax: 0.10.0
libtpu: 0.0.40
codegen_flags: <defaults>
</compile_context>

<pallas_src>
import functools

import jax
import jax.numpy as jnp
from jax.experimental import pallas as pl
from jax.experimental.pallas import tpu as pltpu


# --------------------------------------------------------------------------
# Roll-direction probe (cached; runs once, in interpret mode, no chip needed).
# --------------------------------------------------------------------------
@functools.lru_cache(maxsize=None)
def _roll_matches_jnp_roll():
    """True iff pltpu.roll(x, s, axis) == jnp.roll(x, s, axis)."""
    def probe(x_ref, o_ref):
        o_ref[...] = pltpu.roll(x_ref[...], shift=1, axis=1)

    try:
        x = jnp.arange(8 * 128, dtype=jnp.int32).reshape(8, 128)
        out = pl.pallas_call(
            probe,
            out_shape=jax.ShapeDtypeStruct((8, 128), jnp.int32),
            interpret=True,
        )(x)
        # jnp.roll(x, 1, axis=1)[0, 1] == x[0, 0]
        return bool(out[0, 1] == x[0, 0])
    except Exception:
        return True  # current JAX: pltpu.roll follows jnp.roll semantics


# --------------------------------------------------------------------------
# Host-side helpers: masks, VMEM budget, tile picking.
# --------------------------------------------------------------------------
def _build_masks(h, w, count_h, count_w, plus_dir):
    """(2, L) f32: pre-scaled validity masks for the H-diff and W-diff.

    The kernel always rolls by shift = L - step; `plus_dir` says whether that
    yields the +step neighbour (jnp.roll convention) or the -step neighbour,
    which only changes WHICH band of lanes is valid (the set of squared
    differences is identical either way).
    """
    L = h * w
    lane = jnp.arange(L, dtype=jnp.int32)
    if plus_dir:
        valid_h = lane < (h - 1) * w
        valid_w = (lane % w) != (w - 1)
    else:
        valid_h = lane >= w
        valid_w = (lane % w) != 0
    # Guard degenerate h==1 / w==1 (reference would divide by zero -> NaN;
    # here the corresponding term simply contributes 0).
    sh = (1.0 / count_h) if count_h > 0 else 0.0
    sw = (1.0 / count_w) if count_w > 0 else 0.0
    mh = jnp.where(valid_h, jnp.float32(sh), jnp.float32(0.0))
    mw = jnp.where(valid_w, jnp.float32(sw), jnp.float32(0.0))
    return jnp.stack([mh, mw]).astype(jnp.float32)  # (2, L)


def _vmem_budget():
    """(tile_budget_bytes, vmem_limit_bytes), generation-aware."""
    phys = 64 << 20  # conservative fallback = v7x per-TensorCore VMEM
    try:
        info = pltpu.get_tpu_info()
        for attr in ("vmem_capacity_bytes", "vmem_bytes", "vmem_size_bytes"):
            v = getattr(info, attr, None)
            if v:
                phys = int(v)
                break
    except Exception:
        pass
    budget = (phys * 3) // 4                       # ~48 MiB v7x, ~96 MiB v5e/v6e
    vmem_limit = int(min(phys - (2 << 20), budget + (8 << 20)))
    return budget, vmem_limit


def _pick_row_tile(t8, l, in_itemsize, budget_bytes, input_buffering):
    """Largest multiple-of-8 row tile whose working set fits the VMEM budget.

    Working-set model per row: `input_buffering` pipelined copies of the raw
    input row plus ~6 live f32 (row, L) temporaries inside the kernel
    (x_f32, rolled copies, diffs/squares, combined slab).
    """
    bytes_per_row = l * (input_buffering * in_itemsize + 6 * 4)
    max_tb = max(8, int(budget_bytes // max(bytes_per_row, 1)) // 8 * 8)
    if t8 > 8:
        # Keep >= 2 grid steps so the "parallel" axis can actually be split
        # across v7x's two TensorCores.
        half = -(-t8 // 2)
        max_tb = min(max_tb, max(8, (half + 7) // 8 * 8))
    # TODO(synk): when even an 8-row tile exceeds the budget (huge H*W), add
    # L-axis tiling with a W-lane halo for the H-diff (1-lane halo for the
    # W-diff) instead of falling back to tb=8 with an unbounded L.
    return min(max_tb, t8)


# --------------------------------------------------------------------------
# Kernel.
# --------------------------------------------------------------------------
def _tv_kernel(x_ref, m_ref, o_ref, *, H, W, L):
    x = x_ref[...].astype(jnp.float32)     # (TB, L): one flattened image per row
    TB = x.shape[0]
    m = m_ref[...]                         # (2, L) pre-scaled masks (VMEM-resident)

    sq = None
    if H > 1:
        # Vertical neighbour is W lanes away: one XLU lane roll + VPU math.
        d = pltpu.roll(x, shift=(L - W) % L, axis=1) - x
        sq = d * d * m[0:1, :]
    if W > 1:
        # Horizontal neighbour is 1 lane away.
        d = pltpu.roll(x, shift=(L - 1) % L, axis=1) - x
        t = d * d * m[1:2, :]
        sq = t if sq is None else sq + t
    if sq is None:
        sq = jnp.zeros_like(x)

    # (TB, L) -> (TB//8, 8, L) is a pure split of the sublane-major axis, so
    # the axis-0 sum is whole-vreg VPU adds; the only XLU reduce per grid step
    # is the final lane reduction of one (8, L) slab down to (8, 1).
    folded = sq.reshape(TB // 8, 8, L).sum(axis=0)                 # (8, L)
    o_ref[...] = jnp.sum(folded, axis=1, keepdims=True)[None]      # (1, 8, 1)


# --------------------------------------------------------------------------
# Wrapper: matches TVLoss.forward semantics (NCHW input).
# --------------------------------------------------------------------------
def tv_loss(x, tv_loss_weight=1.0, *, input_dtype=None, input_buffering=2):
    n, c, h, w = x.shape
    if input_dtype is not None:
        # Optional HBM-bandwidth saver (e.g. jnp.bfloat16 on v5e/v6e, which
        # are HBM-bound for this op once mask work is hoisted); accumulation
        # inside the kernel stays float32.  Changes numerics slightly.
        x = x.astype(input_dtype)

    t, l = n * c, h * w
    count_h = c * (h - 1) * w   # TVLoss.tensor_size(x[:, :, 1:, :])
    count_w = c * h * (w - 1)   # TVLoss.tensor_size(x[:, :, :, 1:])

    x2 = x.reshape(t, l)        # lane-dense: one (H*W)-lane row per (n, c) image

    itemsize = jnp.dtype(x2.dtype).itemsize
    budget, vmem_limit = _vmem_budget()
    t8 = -(-t // 8) * 8
    tb = _pick_row_tile(t8, l, itemsize, budget, input_buffering)
    steps = -(-t // tb)
    pad = steps * tb - t
    if pad:
        # Padded rows are all-zero images: their finite differences are zero,
        # so they do not affect the sums.
        x2 = jnp.pad(x2, ((0, pad), (0, 0)))

    masks = _build_masks(h, w, count_h, count_w, _roll_matches_jnp_roll())

    x_spec_kwargs = {}
    if input_buffering != 2:
        x_spec_kwargs["pipeline_mode"] = pl.Buffered(input_buffering)
    x_spec = pl.BlockSpec((tb, l), lambda i: (i, 0), **x_spec_kwargs)

    kernel = functools.partial(_tv_kernel, H=h, W=w, L=l)
    parts = pl.pallas_call(
        kernel,
        out_shape=jax.ShapeDtypeStruct((steps, 8, 1), jnp.float32),
        grid_spec=pltpu.PrefetchScalarGridSpec(
            num_scalar_prefetch=0,
            grid=(steps,),
            in_specs=[
                x_spec,
                pl.BlockSpec((2, l), lambda i: (0, 0)),  # masks stay resident
            ],
            out_specs=pl.BlockSpec((1, 8, 1), lambda i: (i, 0, 0)),
        ),
        compiler_params=pltpu.CompilerParams(
            # Disjoint per-step output blocks -> safe to shard across cores.
            # TODO(synk): try pltpu.CORE_PARALLEL / pl.core_map on v7x.
            dimension_semantics=("parallel",),
            vmem_limit_bytes=vmem_limit,
        ),
    )(x2, masks)

    # Masks are pre-scaled by 1/count_h and 1/count_w, so sum(parts) already
    # equals h_tv/count_h + w_tv/count_w.
    return tv_loss_weight * 2.0 * jnp.sum(parts) / n


def _tv_loss_ref(x, tv_loss_weight=1.0):
    n, c, h, w = x.shape
    count_h = c * (h - 1) * w
    count_w = c * h * (w - 1)
    h_tv = jnp.sum((x[:, :, 1:, :] - x[:, :, : h - 1, :]) ** 2)
    w_tv = jnp.sum((x[:, :, :, 1:] - x[:, :, :, : w - 1]) ** 2)
    return tv_loss_weight * 2.0 * (h_tv / count_h + w_tv / count_w) / n


if __name__ == "__main__":
    key = jax.random.PRNGKey(0)
    x = jax.random.normal(key, (2, 4, 16, 16), dtype=jnp.float32)

    out = jax.block_until_ready(tv_loss(x, tv_loss_weight=1.0))
    ref = jax.block_until_ready(_tv_loss_ref(x, tv_loss_weight=1.0))
    assert jnp.allclose(out, ref, rtol=5e-5, atol=5e-5), (out, ref)

    print("KERNEL_OK")
</pallas_src>

<mosaic_0001>
module attributes {stable_mosaic.version = 11 : i64} {
  func.func @_tv_kernel(%arg0: i32, %arg1: memref<8x256xf32, #tpu.memory_space<vmem>>, %arg2: memref<2x256xf32, #tpu.memory_space<vmem>>, %arg3: memref<1x8x1xf32, #tpu.memory_space<vmem>>) attributes {dimension_semantics = [#tpu.dimension_semantics<parallel>], iteration_bounds = array<i64: 1>, scalar_prefetch = 0 : i64, scratch_operands = 0 : i64, tpu.core_type = #tpu.core_type<tc>, window_params = [{transform_indices = @transform_0, window_bounds = array<i64: 8, 256>}, {pipeline_mode = #tpu.pipeline_mode<synchronous>, transform_indices = @transform_1, window_bounds = array<i64: 2, 256>}, {transform_indices = @transform_2, window_bounds = array<i64: 1, 8, 1>}]} {
    %c0 = arith.constant 0 : index
    %c0_0 = arith.constant 0 : index
    %0 = vector.load %arg1[%c0, %c0_0] : memref<8x256xf32, #tpu.memory_space<vmem>>, vector<8x256xf32>
    %c0_1 = arith.constant 0 : index
    %c0_2 = arith.constant 0 : index
    %1 = vector.load %arg2[%c0_1, %c0_2] : memref<2x256xf32, #tpu.memory_space<vmem>>, vector<2x256xf32>
    %c240_i32 = arith.constant 240 : i32
    %2 = tpu.dynamic_rotate %0 by %c240_i32 dim 1 : vector<8x256xf32>, i32 -> vector<8x256xf32>
    %3 = arith.subf %2, %0 : vector<8x256xf32>
    %4 = arith.mulf %3, %3 : vector<8x256xf32>
    %5 = vector.extract_strided_slice %1 {offsets = [0, 0], sizes = [1, 256], strides = [1, 1]} : vector<2x256xf32> to vector<1x256xf32>
    %6 = vector.broadcast %5 : vector<1x256xf32> to vector<8x256xf32>
    %7 = arith.mulf %4, %6 : vector<8x256xf32>
    %c255_i32 = arith.constant 255 : i32
    %8 = tpu.dynamic_rotate %0 by %c255_i32 dim 1 : vector<8x256xf32>, i32 -> vector<8x256xf32>
    %9 = arith.subf %8, %0 : vector<8x256xf32>
    %10 = arith.mulf %9, %9 : vector<8x256xf32>
    %11 = vector.extract_strided_slice %1 {offsets = [1, 0], sizes = [1, 256], strides = [1, 1]} : vector<2x256xf32> to vector<1x256xf32>
    %12 = vector.broadcast %11 : vector<1x256xf32> to vector<8x256xf32>
    %13 = arith.mulf %10, %12 : vector<8x256xf32>
    %14 = arith.addf %7, %13 : vector<8x256xf32>
    %15 = vector.shape_cast %14 : vector<8x256xf32> to vector<1x8x256xf32>
    %cst = arith.constant dense<0.000000e+00> : vector<8x256xf32>
    %16 = vector.multi_reduction <add>, %15, %cst [0] : vector<1x8x256xf32> to vector<8x256xf32>
    %cst_3 = arith.constant dense<0.000000e+00> : vector<8xf32>
    %17 = vector.multi_reduction <add>, %16, %cst_3 [1] : vector<8x256xf32> to vector<8xf32>
    %18 = vector.shape_cast %17 : vector<8xf32> to vector<8x1xf32>
    %19 = vector.shape_cast %18 : vector<8x1xf32> to vector<1x8x1xf32>
    %c0_4 = arith.constant 0 : index
    %c0_5 = arith.constant 0 : index
    %c0_6 = arith.constant 0 : index
    %20 = vector.load %arg3[%c0_4, %c0_5, %c0_6] : memref<1x8x1xf32, #tpu.memory_space<vmem>>, vector<1x8x1xf32>
    tpu.vector_store %arg3[%c0_4, %c0_5, %c0_6], %19 {strides = array<i32>} : memref<1x8x1xf32, #tpu.memory_space<vmem>>, vector<1x8x1xf32>,
    return
  }
  func.func @transform_0(%arg0: i32) -> (i32, i32) {
    %c0_i32 = arith.constant 0 : i32
    %c0_i32_0 = arith.constant 0 : i32
    return %arg0, %c0_i32 : i32, i32
  }
  func.func @transform_1(%arg0: i32) -> (i32, i32) {
    %c0_i32 = arith.constant 0 : i32
    %c0_i32_0 = arith.constant 0 : i32
    %c0_i32_1 = arith.constant 0 : i32
    return %c0_i32, %c0_i32_0 : i32, i32
  }
  func.func @transform_2(%arg0: i32) -> (i32, i32, i32) {
    %c0_i32 = arith.constant 0 : i32
    %c0_i32_0 = arith.constant 0 : i32
    %c0_i32_1 = arith.constant 0 : i32
    return %arg0, %c0_i32, %c0_i32_0 : i32, i32, i32
  }
}

</mosaic_0001>

<bundles_post_ra>
// kernel: tpu_custom_call.1
= control target key start
LH: loop header
LB: loop body
LE: loop exit
PB: predicated region body
PF: predicated region fallthrough
CT: control target
= control target key end

     0   :  { %7 = vsyncpa [#allocation3], 0  ;;  %s182_s0 = inlined_call_operand.hbm [shape: f32[8,256], index: 0, kind: input, shape index: {}]   ;;  %s183_s1 = inlined_call_operand.hbm [shape: f32[2,256], index: 1, kind: input, shape index: {}]   ;;  %s184_s2 = inlined_call_operand.vmem [shape: f32[1,8,1], index: 2, kind: output, shape index: {}]  }
   0x1   :  { %s14_s11 = sshll.u32 %s182_s0, 4  ;;  %s15_s11 = int_to_ptr.hbm [resolvable:$true] %s14_s11 }
   0x2   :  { %8 = vsyncpa [#allocation5], 0  ;;  %s154_s12 = smov [#allocation2]   ;;  %s25_s16 = sshll.u32 %s183_s1, 4  ;;  %s26_s16 = int_to_ptr.hbm [resolvable:$true] %s25_s16 }
   0x3   :  { %s16_s13 = sshll.u32 %s154_s12, 4  ;;  %s155_s17 = smov [#allocation4]   ;;  %s17_s13 = int_to_ptr.vmem [resolvable:$true] %s16_s13 }
   0x4   :  { %19 = dma.hbm_to_vmem [thread:$0]  %s15_s11, 256, %s17_s13, [#allocation3]  }
   0x5   :  { %s27_s18 = sshll.u32 %s155_s17, 4  ;;  %s28_s18 = int_to_ptr.vmem [resolvable:$true] %s27_s18 }
   0x6   :  { %30 = dma.hbm_to_vmem [thread:$0]  %s26_s16, 64, %s28_s18, [#allocation5]  }
   0x7   :  { %150 = dma.done.wait [#allocation3], 256  }
   0x8   :  { %151 = vsyncadd [#allocation3], 4294967040 }
   0x9   :  { %152 = dma.done.wait [#allocation5], 64  }
   0xa   :  { %153 = vsyncadd [#allocation5], 4294967232  ;;  %v39_v0 = vld [vmem:[#allocation2] sm:$0xff]  ;;  %s156_s0 = smov 127   ;;  %s157_s19 = smov 112   ;;  %v40_v1 = vld [vmem:[#allocation2 + $0x8] sm:$0xff]  ;;  %v46_v2 = vlaneseq }
   0xb   :  { %64 = vrot.lane.b32.xlu1 %v39_v0, %s156_s0  ;;  %42 = vrot.lane.b32.xlu0 %v39_v0, %s157_s19  ;;  %v41_v5 = vld [vmem:[#allocation4] sm:$0xf]  ;;  %vm90_vm2 = vcmask 7168  }
   0xc   :  { %v47_v6 = vand.u32 127, %v46_v2  ;;  %v56_v7 = vperm.slane %v41_v5, 0  ;;  %v57_v8 = vperm.slane %v41_v5, 2  ;;  %v75_v9 = vperm.slane %v41_v5, 1 }
   0xd   :  { %v76_v10 = vperm.slane %v41_v5, 3 }
   0xe   :  { %vm68_vm0 = vcmp.lt.s32.totalorder %v47_v6, 127  ;;  %vm48_vm1 = vcmp.lt.s32.totalorder %v47_v6, 112  ;;  %v60_v13 = vperm.slane %v56_v7, 0  ;;  %v61_v14 = vperm.slane %v57_v8, 0 }
   0xf   :  { %v79_v15 = vperm.slane %v75_v9, 1  ;;  %v80_v16 = vperm.slane %v76_v10, 1 }
  0x13   :  { %66 = vrot.lane.b32.xlu1 %v40_v1, %s156_s0  ;;  %44 = vrot.lane.b32.xlu0 %v40_v1, %s157_s19 }
  0x7d   :  { %v65_v3 = vpop.permute.xlu1 %64  ;;  %v43_v4 = vpop.permute.xlu0 %42 }
  0x85   :  { %v67_v11 = vpop.permute.xlu1 %66  ;;  %v45_v12 = vpop.permute.xlu0 %44 }
  0x86   :  { %v69_v17 = vsel %vm68_vm0, %v65_v3, %v67_v11  ;;  %v70_v18 = vsel %vm68_vm0, %v67_v11, %v65_v3  ;;  %v49_v19 = vsel %vm48_vm1, %v43_v4, %v45_v12  ;;  %v50_v20 = vsel %vm48_vm1, %v45_v12, %v43_v4 }
  0x87   :  { %v71_v21 = vsub.f32 %v69_v17, %v39_v0  ;;  %v72_v22 = vsub.f32 %v70_v18, %v40_v1  ;;  %v51_v23 = vsub.f32 %v49_v19, %v39_v0  ;;  %v52_v24 = vsub.f32 %v50_v20, %v40_v1 }
  0x89   :  { %v73_v25 = vmul.f32 %v71_v21, %v71_v21  ;;  %v74_v26 = vmul.f32 %v72_v22, %v72_v22  ;;  %v53_v27 = vmul.f32 %v51_v23, %v51_v23  ;;  %v54_v28 = vmul.f32 %v52_v24, %v52_v24 }
  0x8b   :  { %v62_v29 = vmul.f32 %v60_v13, %v53_v27  ;;  %v63_v30 = vmul.f32 %v61_v14, %v54_v28  ;;  %v81_v31 = vmul.f32 %v79_v15, %v73_v25  ;;  %v82_v32 = vmul.f32 %v80_v16, %v74_v26 }
  0x8d   :  { %v83_v33 = vadd.f32 %v81_v31, %v62_v29  ;;  %v84_v34 = vadd.f32 %v82_v32, %v63_v30 }
  0x8f   :  { %v87_v35 = vadd.f32 %v84_v34, %v83_v33 }
  0x91   :  { %88 = vadd.xlane.f32.xlu2 %v87_v35 }
 0x104   :  { %v89_v36 = vpop.xlane.xlu2 %88 }
 0x105   :  { %91 = vst.msk [vmem:[%s184_s2] sm:$0xff] %vm90_vm2, %v89_v36 }
 0x106   :  { %96 = vsyncpa [#allocation3], 1 }
 0x107   :  { %97 = vsyncpa [#allocation5], 1 }

</bundles_post_ra>
